<compile_context>
chip_gen: v5e
topology: v5e:2x2
jax: 0.10.0
libtpu: 0.0.40
codegen_flags: <defaults>
</compile_context>

<pallas_src>
import functools

import jax
import jax.numpy as jnp
from jax.experimental import pallas as pl
from jax.experimental.pallas import tpu as pltpu


_LANES = 128
_COMMITMENT_COST = 0.25

# Static tile / row layout of the packed parameter slabs.
_W_TILES = {
    "ew1": 0, "ew2": 1, "ew3": 2,
    "emb": 3, "emb_t": 4,
    "dcw1": 5,          # fused [dw1 | cw1] along lanes
    "dw2": 6, "dw3": 7,
    "cw2": 8,           # packed at row offset `hidden_dim` (reads classifier lanes)
}
_B_ROWS = {
    "eb1": 0, "eb2": 1, "eb3": 2,
    "dcb1": 3,          # fused [db1 | cb1] along lanes
    "db2": 4, "db3": 5, "cb2": 6,
    "norms": 7,         # sum(emb**2, axis=1); pad lanes = 1e30
}
_NUM_W_TILES = 9
_NUM_B_ROWS = 8


def pack_params(params, dims):
    """One-time layout plumbing: pack all weights into zero-padded (128,128)
    tiles and all biases (+ precomputed codebook norms) into an (8,128) slab."""
    input_dim, H, D, K, C = dims
    assert max(input_dim, H, D, K, C) <= _LANES
    assert H + H // 2 <= _LANES, "fused decoder/classifier layer-1 needs H + H/2 <= 128"

    w = jnp.zeros((_NUM_W_TILES * _LANES, _LANES), jnp.float32)

    def put_w(name, row_off, col_off, arr):
        arr = arr.astype(jnp.float32)
        r0 = _W_TILES[name] * _LANES + row_off
        return w.at[r0:r0 + arr.shape[0], col_off:col_off + arr.shape[1]].set(arr)

    w = put_w("ew1", 0, 0, params["ew1"])
    w = put_w("ew2", 0, 0, params["ew2"])
    w = put_w("ew3", 0, 0, params["ew3"])
    w = put_w("emb", 0, 0, params["emb"])
    w = put_w("emb_t", 0, 0, params["emb"].T)
    w = put_w("dcw1", 0, 0, params["dw1"])
    w = put_w("dcw1", 0, H, params["cw1"])
    w = put_w("dw2", 0, 0, params["dw2"])
    w = put_w("dw3", 0, 0, params["dw3"])
    w = put_w("cw2", H, 0, params["cw2"])     # row-shifted so h1's cls lanes feed it directly

    b = jnp.zeros((_NUM_B_ROWS, _LANES), jnp.float32)

    def put_b(name, col_off, vec):
        vec = vec.reshape(-1).astype(jnp.float32)
        return b.at[_B_ROWS[name], col_off:col_off + vec.shape[0]].set(vec)

    b = put_b("eb1", 0, params["eb1"])
    b = put_b("eb2", 0, params["eb2"])
    b = put_b("eb3", 0, params["eb3"])
    b = put_b("dcb1", 0, params["db1"])
    b = put_b("dcb1", H, params["cb1"])
    b = put_b("db2", 0, params["db2"])
    b = put_b("db3", 0, params["db3"])
    b = put_b("cb2", 0, params["cb2"])
    norms = jnp.full((_LANES,), 1e30, jnp.float32).at[:K].set(
        jnp.sum(params["emb"].astype(jnp.float32) ** 2, axis=1))
    b = b.at[_B_ROWS["norms"], :].set(norms)

    return {"w": w, "b": b}


def vqvae_kernel(dims, x_ref, w_ref, b_ref, out_ref):
    input_dim, H, D, K, C = dims

    def W(name):
        # full (128,128) aligned tile load, 8-sublane / 128-lane aligned offsets
        return w_ref[pl.ds(_W_TILES[name] * _LANES, _LANES), :]

    def Brow(name):
        return b_ref[pl.ds(_B_ROWS[name], 1), :]          # (1, 128)

    def linear(v, wn, bn):
        return jnp.dot(v, W(wn), preferred_element_type=jnp.float32) + Brow(bn)

    relu = lambda v: jnp.maximum(v, 0.0)

    x = x_ref[...]                                         # (TB, 128), zero-padded lanes
    TB = x.shape[0]

    # ---------------- encoder ----------------
    h = relu(linear(x, "ew1", "eb1"))
    h = relu(linear(h, "ew2", "eb2"))
    encoded = linear(h, "ew3", "eb3")                      # real lanes [0, D), rest exactly 0

    # ---------------- vector quantizer ----------------
    # d_k = ||emb_k||^2 - 2 <encoded, emb_k>; the per-row ||encoded||^2 term is
    # constant in k, so the argmin is unchanged.  Pad lanes carry 1e30 norms,
    # so padded codes can never be selected.
    d = Brow("norms") - 2.0 * jnp.dot(encoded, W("emb_t"),
                                      preferred_element_type=jnp.float32)   # (TB, 128)
    min_d = jnp.min(d, axis=1, keepdims=True)
    col = jax.lax.broadcasted_iota(jnp.int32, d.shape, 1)
    # first-occurrence argmin (matches torch.argmin / jnp.argmin)
    idx = jnp.min(jnp.where(d == min_d, col, _LANES), axis=1, keepdims=True)  # (TB, 1)
    encodings = (col == idx).astype(jnp.float32)                              # (TB, 128) one-hot
    quantized = jnp.dot(encodings, W("emb"), preferred_element_type=jnp.float32)

    # Per-tile partials for the batch-global reductions (pad lanes contribute 0):
    sq_err = jnp.sum((quantized - encoded) ** 2, axis=(0, 1), keepdims=True)   # (1, 1)
    counts = jnp.sum(encodings, axis=0, keepdims=True)                          # (1, 128)

    # straight-through estimator: forward value is exactly `quantized`
    q = quantized

    # ------- decoder + classifier (layer 1 fused into one matmul) -------
    # h1 lanes [0, H) = relu(q@dw1+db1), lanes [H, H+H/2) = relu(q@cw1+cb1)
    h1 = relu(linear(q, "dcw1", "dcb1"))
    hd = relu(linear(h1, "dw2", "db2"))                    # dw2 pad rows are 0 -> cls lanes ignored
    decoded = linear(hd, "dw3", "db3")                     # real lanes [0, input_dim)
    # TODO(synk): nn.Dropout(0.1) is identity in eval mode; no stochastic mask applied.
    logits = linear(h1, "cw2", "cb2")                      # cw2 packed at rows [H, H+H/2)

    # -------- single unmasked full-width (TB, 512) store --------
    lane = jax.lax.broadcasted_iota(jnp.int32, (TB, _LANES), 1)
    misc = jnp.where(lane == 0, idx.astype(jnp.float32),
                     jnp.where(lane == 1, sq_err, 0.0))
    cnt = jnp.broadcast_to(counts, (TB, _LANES))
    out_ref[...] = jnp.concatenate([decoded, logits, misc, cnt], axis=1)


def supervised_vqvae_forward(x, packed, dims, *, tile_b=8,
                             commitment_cost=_COMMITMENT_COST):
    """Whole SupervisedVQVAE forward in ONE pallas_call (batch-parallel grid).

    Returns (decoded, class_logits, vq_loss, encoding_indices, perplexity),
    matching the PyTorch module.
    """
    B = x.shape[0]
    input_dim, H, D, K, C = dims
    assert B % tile_b == 0 and tile_b % 8 == 0
    nb = B // tile_b

    # lane-dense, zero-padded input slab (layout plumbing)
    x_pad = jnp.zeros((B, _LANES), jnp.float32).at[:, :input_dim].set(
        x.astype(jnp.float32))

    kernel = functools.partial(vqvae_kernel, dims)
    slab = pl.pallas_call(
        kernel,
        out_shape=jax.ShapeDtypeStruct((B, 4 * _LANES), jnp.float32),
        grid=(nb,),
        in_specs=[
            pl.BlockSpec((tile_b, _LANES), lambda i: (i, 0)),       # x tile
            pl.BlockSpec(packed["w"].shape, lambda i: (0, 0)),      # resident weight slab
            pl.BlockSpec(packed["b"].shape, lambda i: (0, 0)),      # resident bias/norms slab
        ],
        out_specs=pl.BlockSpec((tile_b, 4 * _LANES), lambda i: (i, 0)),
        compiler_params=pltpu.CompilerParams(
            dimension_semantics=("parallel",)),                     # megacore on v7x
    )(x_pad, packed["w"], packed["b"])

    decoded = slab[:, :input_dim]
    logits = slab[:, _LANES:_LANES + C]
    idx = slab[:, 2 * _LANES].astype(jnp.int32)

    # Finalize the batch-global scalars from the tiny per-tile partials
    # (one row per batch tile); everything heavy already happened in-kernel.
    sq_total = jnp.sum(slab[::tile_b, 2 * _LANES + 1])
    counts = jnp.sum(slab[::tile_b, 3 * _LANES:3 * _LANES + K], axis=0)
    vq_loss = (1.0 + commitment_cost) * sq_total / (B * D)
    avg_probs = counts / B
    perplexity = jnp.exp(-jnp.sum(avg_probs * jnp.log(avg_probs + 1e-10)))

    return decoded, logits, vq_loss, idx, perplexity


def init_params(key, input_dim, hidden_dim, embedding_dim, num_embeddings, num_classes):
    ks = jax.random.split(key, 16)
    u = lambda k, shape, s=0.1: jax.random.uniform(k, shape, jnp.float32, -s, s)
    return {
        # encoder
        "ew1": u(ks[0], (input_dim, hidden_dim)),
        "eb1": u(ks[1], (1, hidden_dim)),
        "ew2": u(ks[2], (hidden_dim, hidden_dim)),
        "eb2": u(ks[3], (1, hidden_dim)),
        "ew3": u(ks[4], (hidden_dim, embedding_dim)),
        "eb3": u(ks[5], (1, embedding_dim)),
        # VQ codebook: uniform(-1/K, 1/K) like the PyTorch init
        "emb": jax.random.uniform(ks[6], (num_embeddings, embedding_dim),
                                  jnp.float32, -1.0 / num_embeddings, 1.0 / num_embeddings),
        # decoder
        "dw1": u(ks[7], (embedding_dim, hidden_dim)),
        "db1": u(ks[8], (1, hidden_dim)),
        "dw2": u(ks[9], (hidden_dim, hidden_dim)),
        "db2": u(ks[10], (1, hidden_dim)),
        "dw3": u(ks[11], (hidden_dim, input_dim)),
        "db3": u(ks[12], (1, input_dim)),
        # classifier
        "cw1": u(ks[13], (embedding_dim, hidden_dim // 2)),
        "cb1": u(ks[14], (1, hidden_dim // 2)),
        "cw2": u(ks[15], (hidden_dim // 2, num_classes)),
        "cb2": jnp.zeros((1, num_classes), jnp.float32),
    }


def reference_forward(x, p, commitment_cost=0.25):
    relu = lambda v: jnp.maximum(v, 0.0)
    h = relu(x @ p["ew1"] + p["eb1"])
    h = relu(h @ p["ew2"] + p["eb2"])
    enc = h @ p["ew3"] + p["eb3"]
    emb = p["emb"]
    d = jnp.sum(enc ** 2, 1, keepdims=True) + jnp.sum(emb ** 2, 1) - 2 * enc @ emb.T
    idx = jnp.argmin(d, axis=1)
    onehot = jax.nn.one_hot(idx, emb.shape[0], dtype=jnp.float32)
    q = onehot @ emb
    mse = jnp.mean((q - enc) ** 2)
    vq_loss = mse + commitment_cost * mse
    avg = jnp.mean(onehot, axis=0)
    ppl = jnp.exp(-jnp.sum(avg * jnp.log(avg + 1e-10)))
    h = relu(q @ p["dw1"] + p["db1"])
    h = relu(h @ p["dw2"] + p["db2"])
    dec = h @ p["dw3"] + p["db3"]
    h = relu(q @ p["cw1"] + p["cb1"])
    logits = h @ p["cw2"] + p["cb2"]
    return dec, logits, vq_loss, idx, ppl


if __name__ == "__main__":
    B, input_dim, hidden_dim = 16, 16, 32
    embedding_dim, num_embeddings, num_classes = 8, 16, 4
    dims = (input_dim, hidden_dim, embedding_dim, num_embeddings, num_classes)

    key = jax.random.PRNGKey(0)
    kx, kp = jax.random.split(key)
    x = jax.random.normal(kx, (B, input_dim), jnp.float32)
    params = init_params(kp, *dims)

    packed = pack_params(params, dims)                 # one-time layout plumbing

    outs = supervised_vqvae_forward(x, packed, dims, tile_b=8)   # grid=(2,) -> multi-tile path
    outs = jax.block_until_ready(outs)
    decoded, logits, vq_loss, idx, ppl = outs

    ref = reference_forward(x, params)
    assert decoded.shape == (B, input_dim) and logits.shape == (B, num_classes)
    assert jnp.allclose(decoded, ref[0], atol=1e-5)
    assert jnp.allclose(logits, ref[1], atol=1e-5)
    assert jnp.allclose(vq_loss, ref[2], atol=1e-6)
    assert jnp.array_equal(idx, ref[3].astype(jnp.int32))
    assert jnp.allclose(ppl, ref[4], atol=1e-5)

    print("KERNEL_OK")
</pallas_src>

<mosaic_0001>
module attributes {stable_mosaic.version = 11 : i64} {
  func.func @vqvae_kernel(%arg0: i32, %arg1: memref<8x128xf32, #tpu.memory_space<vmem>>, %arg2: memref<1152x128xf32, #tpu.memory_space<vmem>>, %arg3: memref<8x128xf32, #tpu.memory_space<vmem>>, %arg4: memref<8x512xf32, #tpu.memory_space<vmem>>) attributes {dimension_semantics = [#tpu.dimension_semantics<parallel>], iteration_bounds = array<i64: 2>, scalar_prefetch = 0 : i64, scratch_operands = 0 : i64, tpu.core_type = #tpu.core_type<tc>, window_params = [{transform_indices = @transform_0, window_bounds = array<i64: 8, 128>}, {pipeline_mode = #tpu.pipeline_mode<synchronous>, transform_indices = @transform_1, window_bounds = array<i64: 1152, 128>}, {pipeline_mode = #tpu.pipeline_mode<synchronous>, transform_indices = @transform_2, window_bounds = array<i64: 8, 128>}, {transform_indices = @transform_3, window_bounds = array<i64: 8, 512>}]} {
    %c0 = arith.constant 0 : index
    %c0_0 = arith.constant 0 : index
    %0 = vector.load %arg1[%c0, %c0_0] : memref<8x128xf32, #tpu.memory_space<vmem>>, vector<8x128xf32>
    %c0_1 = arith.constant 0 : index
    %c0_2 = arith.constant 0 : index
    %1 = vector.load %arg2[%c0_1, %c0_2] : memref<1152x128xf32, #tpu.memory_space<vmem>>, vector<128x128xf32>
    %cst = arith.constant dense<0.000000e+00> : vector<8x128xf32>
    %2 = tpu.matmul %0, %1, %cst {dimension_numbers = #tpu.dot_dimension_numbers<[1], [0], [0], [1], [0, 0, 1, 1], [], []>} : vector<8x128xf32>, vector<128x128xf32>, vector<8x128xf32> -> vector<8x128xf32>
    %c0_3 = arith.constant 0 : index
    %c0_4 = arith.constant 0 : index
    %3 = vector.load %arg3[%c0_3, %c0_4] : memref<8x128xf32, #tpu.memory_space<vmem>>, vector<1x128xf32>
    %4 = vector.broadcast %3 : vector<1x128xf32> to vector<8x128xf32>
    %5 = arith.addf %2, %4 : vector<8x128xf32>
    %cst_5 = arith.constant 0.000000e+00 : f32
    %6 = vector.broadcast %cst_5 : f32 to vector<8x128xf32>
    %7 = arith.maximumf %5, %6 : vector<8x128xf32>
    %c128 = arith.constant 128 : index
    %c0_6 = arith.constant 0 : index
    %8 = vector.load %arg2[%c128, %c0_6] : memref<1152x128xf32, #tpu.memory_space<vmem>>, vector<128x128xf32>
    %cst_7 = arith.constant dense<0.000000e+00> : vector<8x128xf32>
    %9 = tpu.matmul %7, %8, %cst_7 {dimension_numbers = #tpu.dot_dimension_numbers<[1], [0], [0], [1], [0, 0, 1, 1], [], []>} : vector<8x128xf32>, vector<128x128xf32>, vector<8x128xf32> -> vector<8x128xf32>
    %c1 = arith.constant 1 : index
    %c0_8 = arith.constant 0 : index
    %10 = vector.load %arg3[%c1, %c0_8] : memref<8x128xf32, #tpu.memory_space<vmem>>, vector<1x128xf32>
    %11 = vector.broadcast %10 : vector<1x128xf32> to vector<8x128xf32>
    %12 = arith.addf %9, %11 : vector<8x128xf32>
    %cst_9 = arith.constant 0.000000e+00 : f32
    %13 = vector.broadcast %cst_9 : f32 to vector<8x128xf32>
    %14 = arith.maximumf %12, %13 : vector<8x128xf32>
    %c256 = arith.constant 256 : index
    %c0_10 = arith.constant 0 : index
    %15 = vector.load %arg2[%c256, %c0_10] : memref<1152x128xf32, #tpu.memory_space<vmem>>, vector<128x128xf32>
    %cst_11 = arith.constant dense<0.000000e+00> : vector<8x128xf32>
    %16 = tpu.matmul %14, %15, %cst_11 {dimension_numbers = #tpu.dot_dimension_numbers<[1], [0], [0], [1], [0, 0, 1, 1], [], []>} : vector<8x128xf32>, vector<128x128xf32>, vector<8x128xf32> -> vector<8x128xf32>
    %c2 = arith.constant 2 : index
    %c0_12 = arith.constant 0 : index
    %17 = vector.load %arg3[%c2, %c0_12] : memref<8x128xf32, #tpu.memory_space<vmem>>, vector<1x128xf32>
    %18 = vector.broadcast %17 : vector<1x128xf32> to vector<8x128xf32>
    %19 = arith.addf %16, %18 : vector<8x128xf32>
    %c7 = arith.constant 7 : index
    %c0_13 = arith.constant 0 : index
    %20 = vector.load %arg3[%c7, %c0_13] : memref<8x128xf32, #tpu.memory_space<vmem>>, vector<1x128xf32>
    %c512 = arith.constant 512 : index
    %c0_14 = arith.constant 0 : index
    %21 = vector.load %arg2[%c512, %c0_14] : memref<1152x128xf32, #tpu.memory_space<vmem>>, vector<128x128xf32>
    %cst_15 = arith.constant dense<0.000000e+00> : vector<8x128xf32>
    %22 = tpu.matmul %19, %21, %cst_15 {dimension_numbers = #tpu.dot_dimension_numbers<[1], [0], [0], [1], [0, 0, 1, 1], [], []>} : vector<8x128xf32>, vector<128x128xf32>, vector<8x128xf32> -> vector<8x128xf32>
    %cst_16 = arith.constant 2.000000e+00 : f32
    %23 = vector.broadcast %cst_16 : f32 to vector<8x128xf32>
    %24 = arith.mulf %23, %22 : vector<8x128xf32>
    %25 = vector.broadcast %20 : vector<1x128xf32> to vector<8x128xf32>
    %26 = arith.subf %25, %24 : vector<8x128xf32>
    %cst_17 = arith.constant dense<0x7F800000> : vector<8xf32>
    %27 = vector.multi_reduction <minimumf>, %26, %cst_17 [1] : vector<8x128xf32> to vector<8xf32>
    %28 = vector.shape_cast %27 : vector<8xf32> to vector<8x1xf32>
    %29 = tpu.iota {dimensions = array<i32: 1>} : vector<8x128xi32>
    %30 = vector.broadcast %28 : vector<8x1xf32> to vector<8x128xf32>
    %31 = arith.cmpf oeq, %26, %30 : vector<8x128xf32>
    %c128_i32 = arith.constant 128 : i32
    %32 = vector.broadcast %c128_i32 : i32 to vector<8x128xi32>
    %33 = arith.select %31, %29, %32 : vector<8x128xi1>, vector<8x128xi32>
    %cst_18 = arith.constant dense<2147483647> : vector<8xi32>
    %34 = vector.multi_reduction <minsi>, %33, %cst_18 [1] : vector<8x128xi32> to vector<8xi32>
    %35 = vector.shape_cast %34 : vector<8xi32> to vector<8x1xi32>
    %36 = vector.broadcast %35 : vector<8x1xi32> to vector<8x128xi32>
    %37 = arith.cmpi eq, %29, %36 : vector<8x128xi32>
    %38 = arith.extui %37 : vector<8x128xi1> to vector<8x128xi32>
    %39 = arith.sitofp %38 : vector<8x128xi32> to vector<8x128xf32>
    %c384 = arith.constant 384 : index
    %c0_19 = arith.constant 0 : index
    %40 = vector.load %arg2[%c384, %c0_19] : memref<1152x128xf32, #tpu.memory_space<vmem>>, vector<128x128xf32>
    %cst_20 = arith.constant dense<0.000000e+00> : vector<8x128xf32>
    %41 = tpu.matmul %39, %40, %cst_20 {dimension_numbers = #tpu.dot_dimension_numbers<[1], [0], [0], [1], [0, 0, 1, 1], [], []>} : vector<8x128xf32>, vector<128x128xf32>, vector<8x128xf32> -> vector<8x128xf32>
    %42 = arith.subf %41, %19 : vector<8x128xf32>
    %43 = arith.mulf %42, %42 : vector<8x128xf32>
    %44 = vector.shape_cast %43 : vector<8x128xf32> to vector<1x8x128xf32>
    %cst_21 = arith.constant dense<0.000000e+00> : vector<1xf32>
    %45 = vector.multi_reduction <add>, %44, %cst_21 [1, 2] : vector<1x8x128xf32> to vector<1xf32>
    %46 = vector.shape_cast %45 : vector<1xf32> to vector<1x1x1xf32>
    %47 = vector.extract %46[0, 0, 0] : f32 from vector<1x1x1xf32>
    %48 = vector.broadcast %47 : f32 to vector<1x1xf32>
    %cst_22 = arith.constant dense<0.000000e+00> : vector<128xf32>
    %49 = vector.multi_reduction <add>, %39, %cst_22 [0] : vector<8x128xf32> to vector<128xf32>
    %50 = vector.shape_cast %49 : vector<128xf32> to vector<1x128xf32>
    %c640 = arith.constant 640 : index
    %c0_23 = arith.constant 0 : index
    %51 = vector.load %arg2[%c640, %c0_23] : memref<1152x128xf32, #tpu.memory_space<vmem>>, vector<128x128xf32>
    %cst_24 = arith.constant dense<0.000000e+00> : vector<8x128xf32>
    %52 = tpu.matmul %41, %51, %cst_24 {dimension_numbers = #tpu.dot_dimension_numbers<[1], [0], [0], [1], [0, 0, 1, 1], [], []>} : vector<8x128xf32>, vector<128x128xf32>, vector<8x128xf32> -> vector<8x128xf32>
    %c3 = arith.constant 3 : index
    %c0_25 = arith.constant 0 : index
    %53 = vector.load %arg3[%c3, %c0_25] : memref<8x128xf32, #tpu.memory_space<vmem>>, vector<1x128xf32>
    %54 = vector.broadcast %53 : vector<1x128xf32> to vector<8x128xf32>
    %55 = arith.addf %52, %54 : vector<8x128xf32>
    %cst_26 = arith.constant 0.000000e+00 : f32
    %56 = vector.broadcast %cst_26 : f32 to vector<8x128xf32>
    %57 = arith.maximumf %55, %56 : vector<8x128xf32>
    %c768 = arith.constant 768 : index
    %c0_27 = arith.constant 0 : index
    %58 = vector.load %arg2[%c768, %c0_27] : memref<1152x128xf32, #tpu.memory_space<vmem>>, vector<128x128xf32>
    %cst_28 = arith.constant dense<0.000000e+00> : vector<8x128xf32>
    %59 = tpu.matmul %57, %58, %cst_28 {dimension_numbers = #tpu.dot_dimension_numbers<[1], [0], [0], [1], [0, 0, 1, 1], [], []>} : vector<8x128xf32>, vector<128x128xf32>, vector<8x128xf32> -> vector<8x128xf32>
    %c4 = arith.constant 4 : index
    %c0_29 = arith.constant 0 : index
    %60 = vector.load %arg3[%c4, %c0_29] : memref<8x128xf32, #tpu.memory_space<vmem>>, vector<1x128xf32>
    %61 = vector.broadcast %60 : vector<1x128xf32> to vector<8x128xf32>
    %62 = arith.addf %59, %61 : vector<8x128xf32>
    %cst_30 = arith.constant 0.000000e+00 : f32
    %63 = vector.broadcast %cst_30 : f32 to vector<8x128xf32>
    %64 = arith.maximumf %62, %63 : vector<8x128xf32>
    %c896 = arith.constant 896 : index
    %c0_31 = arith.constant 0 : index
    %65 = vector.load %arg2[%c896, %c0_31] : memref<1152x128xf32, #tpu.memory_space<vmem>>, vector<128x128xf32>
    %cst_32 = arith.constant dense<0.000000e+00> : vector<8x128xf32>
    %66 = tpu.matmul %64, %65, %cst_32 {dimension_numbers = #tpu.dot_dimension_numbers<[1], [0], [0], [1], [0, 0, 1, 1], [], []>} : vector<8x128xf32>, vector<128x128xf32>, vector<8x128xf32> -> vector<8x128xf32>
    %c5 = arith.constant 5 : index
    %c0_33 = arith.constant 0 : index
    %67 = vector.load %arg3[%c5, %c0_33] : memref<8x128xf32, #tpu.memory_space<vmem>>, vector<1x128xf32>
    %68 = vector.broadcast %67 : vector<1x128xf32> to vector<8x128xf32>
    %69 = arith.addf %66, %68 : vector<8x128xf32>
    %c1024 = arith.constant 1024 : index
    %c0_34 = arith.constant 0 : index
    %70 = vector.load %arg2[%c1024, %c0_34] : memref<1152x128xf32, #tpu.memory_space<vmem>>, vector<128x128xf32>
    %cst_35 = arith.constant dense<0.000000e+00> : vector<8x128xf32>
    %71 = tpu.matmul %57, %70, %cst_35 {dimension_numbers = #tpu.dot_dimension_numbers<[1], [0], [0], [1], [0, 0, 1, 1], [], []>} : vector<8x128xf32>, vector<128x128xf32>, vector<8x128xf32> -> vector<8x128xf32>
    %c6 = arith.constant 6 : index
    %c0_36 = arith.constant 0 : index
    %72 = vector.load %arg3[%c6, %c0_36] : memref<8x128xf32, #tpu.memory_space<vmem>>, vector<1x128xf32>
    %73 = vector.broadcast %72 : vector<1x128xf32> to vector<8x128xf32>
    %74 = arith.addf %71, %73 : vector<8x128xf32>
    %75 = tpu.iota {dimensions = array<i32: 1>} : vector<8x128xi32>
    %c0_i32 = arith.constant 0 : i32
    %76 = vector.broadcast %c0_i32 : i32 to vector<8x128xi32>
    %77 = arith.cmpi eq, %75, %76 : vector<8x128xi32>
    %78 = arith.sitofp %35 : vector<8x1xi32> to vector<8x1xf32>
    %c1_i32 = arith.constant 1 : i32
    %79 = vector.broadcast %c1_i32 : i32 to vector<8x128xi32>
    %80 = arith.cmpi eq, %75, %79 : vector<8x128xi32>
    %cst_37 = arith.constant 0.000000e+00 : f32
    %81 = vector.shape_cast %48 : vector<1x1xf32> to vector<1x1xf32>
    %82 = vector.broadcast %81 : vector<1x1xf32> to vector<8x128xf32>
    %83 = vector.broadcast %cst_37 : f32 to vector<8x128xf32>
    %84 = arith.select %80, %82, %83 : vector<8x128xi1>, vector<8x128xf32>
    %85 = vector.shape_cast %78 : vector<8x1xf32> to vector<8x1xf32>
    %86 = vector.broadcast %85 : vector<8x1xf32> to vector<8x128xf32>
    %87 = arith.select %77, %86, %84 : vector<8x128xi1>, vector<8x128xf32>
    %88 = vector.shape_cast %50 : vector<1x128xf32> to vector<1x128xf32>
    %89 = vector.broadcast %88 : vector<1x128xf32> to vector<8x128xf32>
    %90 = tpu.concatenate %69, %74, %87, %89 in 1 : vector<8x128xf32>, vector<8x128xf32>, vector<8x128xf32>, vector<8x128xf32> -> vector<8x512xf32>
    %c0_38 = arith.constant 0 : index
    %c0_39 = arith.constant 0 : index
    %91 = vector.load %arg4[%c0_38, %c0_39] : memref<8x512xf32, #tpu.memory_space<vmem>>, vector<8x512xf32>
    tpu.vector_store %arg4[%c0_38, %c0_39], %90 {strides = array<i32>} : memref<8x512xf32, #tpu.memory_space<vmem>>, vector<8x512xf32>,
    return
  }
  func.func @transform_0(%arg0: i32) -> (i32, i32) {
    %c0_i32 = arith.constant 0 : i32
    %c0_i32_0 = arith.constant 0 : i32
    return %arg0, %c0_i32 : i32, i32
  }
  func.func @transform_1(%arg0: i32) -> (i32, i32) {
    %c0_i32 = arith.constant 0 : i32
    %c0_i32_0 = arith.constant 0 : i32
    %c0_i32_1 = arith.constant 0 : i32
    return %c0_i32, %c0_i32_0 : i32, i32
  }
  func.func @transform_2(%arg0: i32) -> (i32, i32) {
    %c0_i32 = arith.constant 0 : i32
    %c0_i32_0 = arith.constant 0 : i32
    %c0_i32_1 = arith.constant 0 : i32
    return %c0_i32, %c0_i32_0 : i32, i32
  }
  func.func @transform_3(%arg0: i32) -> (i32, i32) {
    %c0_i32 = arith.constant 0 : i32
    %c0_i32_0 = arith.constant 0 : i32
    return %arg0, %c0_i32 : i32, i32
  }
}

</mosaic_0001>

<bundles_post_ra>
// kernel: tpu_custom_call.1
= control target key start
LH: loop header
LB: loop body
LE: loop exit
PB: predicated region body
PF: predicated region fallthrough
CT: control target
= control target key end

     0   :  { %8 = vsyncpa [#allocation3], 0  ;;  %s1181_s0 = inlined_call_operand.hbm [shape: f32[16,128], index: 0, kind: input, shape index: {}]   ;;  %s1182_s1 = inlined_call_operand.hbm [shape: f32[1152,128], index: 1, kind: input, shape index: {}]   ;;  %s1183_s2 = inlined_call_operand.hbm [shape: f32[8,128], index: 2, kind: input, shape index: {}]   ;;  %s1184_s3 = inlined_call_operand.hbm [shape: f32[16,512], index: 3, kind: output, shape index: {}]  }
   0x1   :  { %10 = vsyncpa [#allocation3 + $0x1], 0 }
   0x2   :  { %11 = vsyncpa [#allocation6], 0 }
   0x3   :  { %12 = vsyncpa [#allocation4], 0 }
   0x4   :  { %14 = vsyncpa [#allocation4 + $0x1], 0  ;;  %s1011_s12 = smov 0   ;;  %s1013_s13 = smov 0  }
   0x5   :  { %s1015_s14 = smov 0   ;;  %s1017_s15 = smov 0  }
   0x6 LB: > { %s130_s18 = sshll.u32 %s1182_s1, 4  ;;  %s1035_s19 = sadd.s32 4294967295, %s983_s15   ;;  %s983_s15 = sphi %s1017_s15, %s1195_s15   ;;  %s979_s14 = sphi %s1015_s14, %s1194_s14   ;;  %s975_s13 = sphi %s1013_s13, %s1193_s13   ;;  %s971_s12 = sphi %s1011_s12, %s1192_s12   ;;  %s131_s18 = int_to_ptr.hbm [resolvable:$true] %s130_s18 }
   0x7   : > { %p723_p0 = scmp.ge.s32.totalorder %s983_s15, 1  ;;  %p41_p1 = scmp.eq.s32.totalorder %s1035_s19, 0 }
   0x8   : > { %p119_p2 = scmp.lt.s32.totalorder %s983_s15, 3  ;;  %s985_s21 = smov [#allocation5]  }
   0x9   : > { %s132_s22 = sshll.u32 %s985_s21, 4  ;;  %s145_s25 = sshll.u32 %s1183_s2, 4  ;;  %s133_s22 = int_to_ptr.vmem [resolvable:$true] %s132_s22  ;;  %s146_s25 = int_to_ptr.hbm [resolvable:$true] %s145_s25 }
   0xa   : > { %p1040_p3 = pnand %p723_p0, %p119_p2  ;;  %s986_s26 = smov [#allocation7]  }
   0xb   : > { %s147_s27 = sshll.u32 %s986_s26, 4  ;;  %s987_s28 = smov 128   ;;  %s148_s27 = int_to_ptr.vmem [resolvable:$true] %s147_s27 }
   0xc   : > { %p756_p4 = pneg %p1040_p3  ;;  %s988_s29 = smov 8  }
   0xd   : > { %s722_s30 = sadd.s32 4294967294, %s983_s15   ;;  %s1054_s4 = sadd.s32 1, %s983_s15  }
   0xe   : > { %p757_p6 = pnand %p756_p4, %p41_p1  ;;  %s24_s5 = ssub.s32 %s983_s15, %s1054_s4 }
   0xf   : > { %s27_s6 = sadd.s32 1, %s979_s14  ;;  %p25_p7 = scmp.eq.s32.totalorder %s24_s5, 0 }
  0x10   : > { %759 = dma.hbm_to_vmem [thread:$0]  (!%p757_p6), %s131_s18, 18432, %s133_s22, [#allocation6], %s987_s28, %s987_s28, %s988_s29  }
  0x11   : > { %762 = dma.hbm_to_vmem [thread:$0]  (!%p757_p6), %s146_s25, 128, %s148_s27, [#allocation6]  }
  0x12   : > { %p34_p8 = scmp.ne.s32.totalorder %s979_s14, %s975_s13  ;;  %p35_p9 = scmp.eq.s32.totalorder %s983_s15, 0 }
  0x13   : > { %p40_p10 = scmp.ne.s32.totalorder %s975_s13, %s971_s12  ;;  %p106_p13 = scmp.eq.s32.totalorder %s1035_s19, 1 }
  0x14   : > { %s1065_s7 = scalar_select %p25_p7, %s979_s14, %s27_s6  }
  0x15   : > { %p1067_p11 = por %p35_p9, %p34_p8  ;;  %p1073_p12 = por %p41_p1, %p40_p10 }
  0x16   : > { %p112_p0 = scmp.eq.s32.totalorder %s722_s30, 1  ;;  %p773_p2 = scmp.lt.s32.totalorder %s983_s15, 2 }
  0x17   : > { %s158_s10 = sand.u32 1, %s979_s14   ;;  %p1080_p4 = por %p106_p13, %p34_p8 }
  0x18   : > { %p1084_p6 = por %p112_p0, %p40_p10  ;;  %s727_s17 = sshll.u32 %s158_s10, 3 }
  0x19   : > { %s728_s18 = sshll.u32 %s983_s15, 3  ;;  %s162_s24 = scalar_lea.vmem [#allocation2], %s727_s17 }
  0x1a   : > { %s166_s23 = scalar_lea.hbm %s1181_s0, %s728_s18  ;;  %s170_s25 = sshll.u32 %s162_s24, 4  ;;  %s171_s25 = int_to_ptr.vmem [resolvable:$true] %s170_s25 }
  0x1b   : > { %s168_s26 = sshll.u32 %s166_s23, 4  ;;  %p1094_p7 = pnand %p773_p2, %p1067_p11  ;;  %s169_s26 = int_to_ptr.hbm [resolvable:$true] %s168_s26 }
  0x1c   : > { %s159_s28 = scalar_lea.sflag [#allocation3], %s158_s10  ;;  %s883_s29 = sshra.s32 %s169_s26, 4  ;;  %s884_s29 = int_to_ptr.hbm [resolvable:$true] %s883_s29 }
  0x1d   : > { %s885_s30 = scalar_lea.hbm %s884_s29, 8  ;;  %p887_p9 = pneg %p1094_p7 }
  0x1e   : > { %p886_p8 = scmp.ne.s32.totalorder %s884_s29, %s885_s30  ;;  %s890_s17 = scalar_lea.hbm %s1181_s0, 16 }
  0x1f   : > { %p891_p11 = scmp.lt.s32.totalorder %s884_s29, %s1181_s0  ;;  %p892_p0 = scmp.lt.s32.totalorder %s890_s17, %s885_s30 }
  0x20   : > { %p888_p10 = pnand %p887_p9, %p886_p8 }
  0x21   : > { %p893_p2 = por %p892_p0, %p891_p11 }
  0x22   : > { %p889_p13 = pneg %p888_p10 }
  0x24   : > { %p894_p5 = pnand %p893_p2, %p889_p13 }
  0x26   : > { %897 = shalt.err (!%p894_p5)
}
  0x27   : > { %766 = dma.hbm_to_vmem [thread:$0]  (!%p1094_p7), %s169_s26, 128, %s171_s25, %s159_s28  }
  0x28   : > { %179 = sbr.rel (%p1040_p3) target bundleno = 1500 (0x5dc), region = 32  ;;  %s1111_s10 = sand.u32 (!%p1040_p3), 1, %s975_s13  }
  0x29   : > { %s730_s21 = sshll.u32 (!%p1040_p3), %s1111_s10, 3  ;;  %s182_s22 = scalar_lea.sflag (!%p1040_p3), [#allocation3], %s1111_s10 }
  0x2a   : > { %s1115_s23 = scalar_lea.vmem (!%p1040_p3), [#allocation2], %s730_s21 }
  0x2d   : > { %958 = dma.done.wait (%p1073_p12), %s182_s22, 128  }
  0x2e   : > { %960 = vsyncadd (%p1073_p12), %s182_s22, 4294967168 }
  0x2f   : > { %962 = dma.done.wait (%p41_p1), [#allocation6], 18560  }
  0x30   : > { %964 = vsyncadd (%p41_p1), [#allocation6], 4294948736  ;;  %v235_v0 = vld [vmem:[#allocation5 + $0x78] sm:$0xff]  ;;  %v234_v1 = vld [vmem:[#allocation5 + $0x70] sm:$0xff]  ;;  %s733_s20 = sshll.u32 %s1111_s10, 5  ;;  %s741_s25 = sshll.u32 %s1035_s19, 5 }
  0x31   : > { %238 = vmatpush.msra.mxu0 %v235_v0  ;;  %v233_v2 = vld [vmem:[#allocation5 + $0x68] sm:$0xff]  ;;  %v232_v3 = vld [vmem:[#allocation5 + $0x60] sm:$0xff]  ;;  %v274_v4 = vld [vmem:[#allocation5 + $0xf8] sm:$0xff]  ;;  %s1137_s9 = scalar_lea.vmem [#allocation8], %s733_s20  ;;  %s628_s28 = scalar_lea.hbm %s1184_s3, %s741_s25 }
  0x32   : > { %v231_v5 = vld [vmem:[#allocation5 + $0x58] sm:$0xff]  ;;  %277 = vmatpush.msra.mxu1 %v274_v4  ;;  %v273_v6 = vld [vmem:[#allocation5 + $0xf0] sm:$0xff]  ;;  %v272_v7 = vld [vmem:[#allocation5 + $0xe8] sm:$0xff]  ;;  %s630_s29 = sshll.u32 %s1137_s9, 4  ;;  %s632_s30 = sshll.u32 %s628_s28, 4  ;;  %s631_s29 = int_to_ptr.vmem [resolvable:$true] %s630_s29  ;;  %s633_s30 = int_to_ptr.hbm [resolvable:$true] %s632_s30 }
  0x33   : > { %239 = vmatpush.msra.mxu0 %v234_v1  ;;  %v230_v8 = vld [vmem:[#allocation5 + $0x50] sm:$0xff]  ;;  %v229_v9 = vld [vmem:[#allocation5 + $0x48] sm:$0xff]  ;;  %v271_v10 = vld [vmem:[#allocation5 + $0xe0] sm:$0xff]  ;;  %s617_s5 = scalar_lea.sflag [#allocation4], %s1111_s10  ;;  %s927_s6 = sshra.s32 %s633_s30, 4  ;;  %s928_s6 = int_to_ptr.hbm [resolvable:$true] %s927_s6 }
  0x34   : > { %278 = vmatpush.msra.mxu1 %v273_v6  ;;  %v228_v11 = vld [vmem:[#allocation5 + $0x40] sm:$0xff]  ;;  %v270_v12 = vld [vmem:[#allocation5 + $0xd8] sm:$0xff]  ;;  %v269_v13 = vld [vmem:[#allocation5 + $0xd0] sm:$0xff]  ;;  %s929_s17 = scalar_lea.hbm %s928_s6, 32  ;;  %s933_s8 = scalar_lea.hbm %s1184_s3, 64 }
  0x35   : > { %240 = vmatpush.msra.mxu0 %v233_v2  ;;  %v227_v14 = vld [vmem:[#allocation5 + $0x38] sm:$0xff]  ;;  %v268_v15 = vld [vmem:[#allocation5 + $0xc8] sm:$0xff]  ;;  %v226_v16 = vld [vmem:[#allocation5 + $0x30] sm:$0xff]  ;;  %p930_p1 = scmp.ne.s32.totalorder %s928_s6, %s929_s17  ;;  %p934_p12 = scmp.lt.s32.totalorder %s928_s6, %s1184_s3 }
  0x36   : > { %279 = vmatpush.msra.mxu1 %v272_v7  ;;  %v267_v17 = vld [vmem:[#allocation5 + $0xc0] sm:$0xff]  ;;  %v225_v18 = vld [vmem:[#allocation5 + $0x28] sm:$0xff]  ;;  %v266_v19 = vld [vmem:[#allocation5 + $0xb8] sm:$0xff]  ;;  %p935_p7 = scmp.lt.s32.totalorder %s933_s8, %s929_s17 }
  0x37   : > { %241 = vmatpush.msra.mxu0 %v232_v3  ;;  %v224_v20 = vld [vmem:[#allocation5 + $0x20] sm:$0xff]  ;;  %v265_v21 = vld [vmem:[#allocation5 + $0xb0] sm:$0xff]  ;;  %v223_v22 = vld [vmem:[#allocation5 + $0x18] sm:$0xff]  ;;  %p931_p3 = pnand %p930_p1, %p1080_p4 }
  0x38   : > { %280 = vmatpush.msra.mxu1 %v271_v10  ;;  %v264_v23 = vld [vmem:[#allocation5 + $0xa8] sm:$0xff]  ;;  %v222_v24 = vld [vmem:[#allocation5 + $0x10] sm:$0xff]  ;;  %v263_v25 = vld [vmem:[#allocation5 + $0xa0] sm:$0xff]  ;;  %p936_p8 = por %p935_p7, %p934_p12 }
  0x39   : > { %242 = vmatpush.msra.mxu0 %v231_v5  ;;  %v221_v26 = vld [vmem:[#allocation5 + $0x8] sm:$0xff]  ;;  %v262_v27 = vld [vmem:[#allocation5 + $0x98] sm:$0xff]  ;;  %v220_v28 = vld [vmem:[#allocation5] sm:$0xff]  ;;  %p932_p5 = pneg %p931_p3 }
  0x3a   : > { %281 = vmatpush.msra.mxu1 %v270_v12  ;;  %v219_v29 = vld [vmem:[%s1115_s23] sm:$0xff]  ;;  %v260_v31 = vld [vmem:[#allocation5 + $0x88] sm:$0xff]  ;;  %v259_v32 = vld [vmem:[#allocation5 + $0x80] sm:$0xff] }
  0x3b   : > { %243 = vmatpush.msra.mxu0 %v230_v8  ;;  %v261_v30 = vld [vmem:[#allocation5 + $0x90] sm:$0xff]  ;;  %v313_v33 = vld [vmem:[#allocation5 + $0x178] sm:$0xff]  ;;  %v311_v35 = vld [vmem:[#allocation5 + $0x168] sm:$0xff]  ;;  %p937_p9 = pnand %p936_p8, %p932_p5 }
  0x3c   : > { %282 = vmatpush.msra.mxu1 %v269_v13  ;;  %v312_v34 = vld [vmem:[#allocation5 + $0x170] sm:$0xff]  ;;  %316 = vmatpush.msra.mxu2 %v313_v33  ;;  %v310_v36 = vld [vmem:[#allocation5 + $0x160] sm:$0xff]  ;;  %v309_v37 = vld [vmem:[#allocation5 + $0x158] sm:$0xff] }
  0x3d   : > { %244 = vmatpush.msra.mxu0 %v229_v9  ;;  %v308_v38 = vld [vmem:[#allocation5 + $0x150] sm:$0xff]  ;;  %v307_v39 = vld [vmem:[#allocation5 + $0x148] sm:$0xff]  ;;  %v306_v40 = vld [vmem:[#allocation5 + $0x140] sm:$0xff] }
  0x3e   : > { %283 = vmatpush.msra.mxu1 %v268_v15  ;;  %317 = vmatpush.msra.mxu2 %v312_v34  ;;  %v305_v41 = vld [vmem:[#allocation5 + $0x138] sm:$0xff]  ;;  %v304_v42 = vld [vmem:[#allocation5 + $0x130] sm:$0xff]  ;;  %v303_v43 = vld [vmem:[#allocation5 + $0x128] sm:$0xff] }
  0x3f   : > { %245 = vmatpush.msra.mxu0 %v228_v11  ;;  %v302_v44 = vld [vmem:[#allocation5 + $0x120] sm:$0xff]  ;;  %v301_v45 = vld [vmem:[#allocation5 + $0x118] sm:$0xff]  ;;  %v300_v50 = vld [vmem:[#allocation5 + $0x110] sm:$0xff] }
  0x40   : > { %284 = vmatpush.msra.mxu1 %v267_v17  ;;  %318 = vmatpush.msra.mxu2 %v311_v35  ;;  %v815_v46 = vld [vmem:[#allocation7] ss:$0 sm:$0xff]  ;;  %v299_v51 = vld [vmem:[#allocation5 + $0x108] sm:$0xff]  ;;  %v352_v53 = vld [vmem:[#allocation5 + $0x278] sm:$0xff] }
  0x41   : > { %246 = vmatpush.msra.mxu0 %v227_v14  ;;  %v298_v52 = vld [vmem:[#allocation5 + $0x100] sm:$0xff]  ;;  %v351_v54 = vld [vmem:[#allocation5 + $0x270] sm:$0xff]  ;;  %353 = vmatpush.msra.mxu3 %v352_v53  ;;  %v350_v55 = vld [vmem:[#allocation5 + $0x268] sm:$0xff] }
  0x42   : > { %285 = vmatpush.msra.mxu1 %v266_v19  ;;  %319 = vmatpush.msra.mxu2 %v310_v36  ;;  %v349_v56 = vld [vmem:[#allocation5 + $0x260] sm:$0xff]  ;;  %v348_v57 = vld [vmem:[#allocation5 + $0x258] sm:$0xff]  ;;  %v347_v58 = vld [vmem:[#allocation5 + $0x250] sm:$0xff] }
  0x43   : > { %247 = vmatpush.msra.mxu0 %v226_v16  ;;  %354 = vmatpush.msra.mxu3 %v351_v54  ;;  %v346_v59 = vld [vmem:[#allocation5 + $0x248] sm:$0xff]  ;;  %v345_v60 = vld [vmem:[#allocation5 + $0x240] sm:$0xff]  ;;  %v344_v61 = vld [vmem:[#allocation5 + $0x238] sm:$0xff]  ;;  %v378_v16 = vlaneseq }
  0x44   : > { %286 = vmatpush.msra.mxu1 %v265_v21  ;;  %320 = vmatpush.msra.mxu2 %v309_v37  ;;  %v343_v62 = vld [vmem:[#allocation5 + $0x230] sm:$0xff]  ;;  %v342_v63 = vld [vmem:[#allocation5 + $0x228] sm:$0xff]  ;;  %v341_v0 = vld [vmem:[#allocation5 + $0x220] sm:$0xff] }
  0x45   : > { %248 = vmatpush.msra.mxu0 %v225_v18  ;;  %355 = vmatpush.msra.mxu3 %v350_v55  ;;  %v340_v1 = vld [vmem:[#allocation5 + $0x218] sm:$0xff]  ;;  %v816_v2 = vld [vmem:[#allocation7 + $0x1] ss:$0 sm:$0xff]  ;;  %v339_v3 = vld [vmem:[#allocation5 + $0x210] sm:$0xff]  ;;  %v1129_v17 = vand.u32 127, %v378_v16 }
  0x46   : > { %287 = vmatpush.msra.mxu1 %v264_v23  ;;  %321 = vmatpush.msra.mxu2 %v308_v38  ;;  %v338_v7 = vld [vmem:[#allocation5 + $0x208] sm:$0xff]  ;;  %v337_v8 = vld [vmem:[#allocation5 + $0x200] sm:$0xff]  ;;  %v413_v23 = vld [vmem:[#allocation5 + $0x1f0] sm:$0xff] }
  0x47   : > { %249 = vmatpush.msra.mxu0 %v224_v20  ;;  %356 = vmatpush.msra.mxu3 %v349_v56  ;;  %v817_v9 = vld [vmem:[#allocation7 + $0x2] ss:$0 sm:$0xff]  ;;  %v818_v12 = vld [vmem:[#allocation7 + $0x7] ss:$0 sm:$0xff]  ;;  %v402_v34 = vld [vmem:[#allocation5 + $0x198] sm:$0xff]  ;;  %vm608_vm3 = vcmp.eq.s32.totalorder %v1129_v17, 1 }
  0x48   : > { %288 = vmatpush.msra.mxu1 %v263_v25  ;;  %322 = vmatpush.msra.mxu2 %v307_v39  ;;  %v411_v25 = vld [vmem:[#allocation5 + $0x1e0] sm:$0xff]  ;;  %v401_v39 = vld [vmem:[#allocation5 + $0x190] sm:$0xff]  ;;  %vm606_vm4 = vcmp.eq.s32.totalorder %v1129_v17, 0 }
  0x49   : > { %250 = vmatpush.msra.mxu0 %v223_v22  ;;  %357 = vmatpush.msra.mxu3 %v348_v57  ;;  %v414_v22 = vld [vmem:[#allocation5 + $0x1f8] sm:$0xff]  ;;  %v403_v33 = vld [vmem:[#allocation5 + $0x1a0] sm:$0xff]  ;;  %v458_v55 = vld [vmem:[#allocation5 + $0x2b0] sm:$0xff] }
  0x4a   : > { %289 = vmatpush.msra.mxu1 %v262_v27  ;;  %323 = vmatpush.msra.mxu2 %v306_v40  ;;  %v409_v27 = vld [vmem:[#allocation5 + $0x1d0] sm:$0xff]  ;;  %v400_v40 = vld [vmem:[#allocation5 + $0x188] sm:$0xff]  ;;  %v580_v16 = vld [vmem:[#allocation5 + $0x460] sm:$0xff] }
  0x4b   : > { %251 = vmatpush.msra.mxu0 %v222_v24  ;;  %358 = vmatpush.msra.mxu3 %v347_v58  ;;  %v412_v24 = vld [vmem:[#allocation5 + $0x1e8] sm:$0xff]  ;;  %v456_v58 = vld [vmem:[#allocation5 + $0x2a0] sm:$0xff] }
  0x4c   : > { %290 = vmatpush.msra.mxu1 %v261_v30  ;;  %324 = vmatpush.msra.mxu2 %v305_v41  ;;  %v406_v30 = vld [vmem:[#allocation5 + $0x1b8] sm:$0xff]  ;;  %v399_v41 = vld [vmem:[#allocation5 + $0x180] sm:$0xff]  ;;  %v457_v57 = vld [vmem:[#allocation5 + $0x2a8] sm:$0xff] }
  0x4d   : > { %252 = vmatpush.msra.mxu0 %v221_v26  ;;  %359 = vmatpush.msra.mxu3 %v346_v59  ;;  %v410_v26 = vld [vmem:[#allocation5 + $0x1d8] sm:$0xff]  ;;  %v989_v59 = vmov 0.0  }
  0x4e   : > { %291 = vmatpush.msra.mxu1 %v260_v31  ;;  %325 = vmatpush.msra.mxu2 %v304_v42  ;;  %v405_v31 = vld [vmem:[#allocation5 + $0x1b0] sm:$0xff]  ;;  %v467_v42 = vld [vmem:[#allocation5 + $0x2f8] sm:$0xff] }
  0x4f   : > { %253 = vmatpush.msra.mxu0 %v220_v28  ;;  %360 = vmatpush.msra.mxu3 %v345_v60  ;;  %v408_v28 = vld [vmem:[#allocation5 + $0x1c8] sm:$0xff] }
  0x50   : > { %254 = vmatmul.f32.vlgmr.msra.gmra.mxu0 %v219_v29  ;;  %292 = vmatpush.msra.mxu1 %v259_v32  ;;  %v407_v29 = vld [vmem:[#allocation5 + $0x1c0] sm:$0xff]  ;;  %v404_v32 = vld [vmem:[#allocation5 + $0x1a8] sm:$0xff] }
  0x51   : > { %326 = vmatpush.msra.mxu2 %v303_v43  ;;  %361 = vmatpush.msra.mxu3 %v344_v61  ;;  %v466_v43 = vld [vmem:[#allocation5 + $0x2f0] sm:$0xff]  ;;  %v990_v61 = vmov 1.0  }
  0x52   : > { %415 = vmatpush.msrb.mxu0 %v414_v22  ;;  %470 = vmatpush.msrb.mxu1 %v467_v42  ;;  %v500_v22 = vld [vmem:[#allocation5 + $0x348] sm:$0xff] }
  0x53   : > { %327 = vmatpush.msra.mxu2 %v302_v44  ;;  %362 = vmatpush.msra.mxu3 %v343_v62  ;;  %v465_v44 = vld [vmem:[#allocation5 + $0x2e8] sm:$0xff] }
  0x54   : > { %416 = vmatpush.msrb.mxu0 %v413_v23  ;;  %471 = vmatpush.msrb.mxu1 %v466_v43  ;;  %v577_v23 = vld [vmem:[#allocation5 + $0x448] sm:$0xff]  ;;  %v568_v43 = vld [vmem:[#allocation5 + $0x400] sm:$0xff] }
  0x55   : > { %328 = vmatpush.msra.mxu2 %v301_v45  ;;  %363 = vmatpush.msra.mxu3 %v342_v63  ;;  %v464_v45 = vld [vmem:[#allocation5 + $0x2e0] sm:$0xff]  ;;  %v455_v63 = vld [vmem:[#allocation5 + $0x298] sm:$0xff]  ;;  %v569_v42 = vld [vmem:[#allocation5 + $0x408] sm:$0xff] }
  0x56   : > { %417 = vmatpush.msrb.mxu0 %v412_v24  ;;  %472 = vmatpush.msrb.mxu1 %v465_v44  ;;  %v499_v24 = vld [vmem:[#allocation5 + $0x340] sm:$0xff] }
  0x57   : > { %329 = vmatpush.msra.mxu2 %v300_v50  ;;  %364 = vmatpush.msra.mxu3 %v341_v0  ;;  %v460_v50 = vld [vmem:[#allocation5 + $0x2c0] sm:$0xff] }
  0x58   : > { %418 = vmatpush.msrb.mxu0 %v411_v25  ;;  %473 = vmatpush.msrb.mxu1 %v464_v45  ;;  %v576_v25 = vld [vmem:[#allocation5 + $0x440] sm:$0xff] }
  0x59   : > { %330 = vmatpush.msra.mxu2 %v299_v51  ;;  %365 = vmatpush.msra.mxu3 %v340_v1  ;;  %v459_v51 = vld [vmem:[#allocation5 + $0x2b8] sm:$0xff]  ;;  %v454_v1 = vld [vmem:[#allocation5 + $0x290] sm:$0xff] }
  0x5a   : > { %419 = vmatpush.msrb.mxu0 %v410_v26  ;;  %v498_v26 = vld [vmem:[#allocation5 + $0x338] sm:$0xff] }
  0x5b   : > { %331 = vmatpush.msra.mxu2 %v298_v52  ;;  %366 = vmatpush.msra.mxu3 %v339_v3  ;;  %v453_v3 = vld [vmem:[#allocation5 + $0x288] sm:$0xff] }
  0x5c   : > { %420 = vmatpush.msrb.mxu0 %v409_v27  ;;  %v575_v27 = vld [vmem:[#allocation5 + $0x438] sm:$0xff] }
  0x5d   : > { %367 = vmatpush.msra.mxu3 %v338_v7  ;;  %v452_v7 = vld [vmem:[#allocation5 + $0x280] sm:$0xff] }
  0x5e   : > { %421 = vmatpush.msrb.mxu0 %v408_v28  ;;  %v497_v28 = vld [vmem:[#allocation5 + $0x330] sm:$0xff] }
  0x5f   : > { %368 = vmatpush.msra.mxu3 %v337_v8  ;;  %v506_v8 = vld [vmem:[#allocation5 + $0x378] sm:$0xff] }
  0x60   : > { %422 = vmatpush.msrb.mxu0 %v407_v29  ;;  %509 = vmatpush.msrb.mxu2 %v506_v8  ;;  %v574_v29 = vld [vmem:[#allocation5 + $0x430] sm:$0xff]  ;;  %v533_v8 = vld [vmem:[#allocation5 + $0x398] sm:$0xff] }
  0x62   : > { %423 = vmatpush.msrb.mxu0 %v406_v30  ;;  %v496_v30 = vld [vmem:[#allocation5 + $0x328] sm:$0xff] }
  0x64   : > { %424 = vmatpush.msrb.mxu0 %v405_v31  ;;  %v573_v31 = vld [vmem:[#allocation5 + $0x428] sm:$0xff] }
  0x66   : > { %425 = vmatpush.msrb.mxu0 %v404_v32 }
  0x68   : > { %426 = vmatpush.msrb.mxu0 %v403_v33 }
  0x6a   : > { %427 = vmatpush.msrb.mxu0 %v402_v34 }
  0x6c   : > { %428 = vmatpush.msrb.mxu0 %v401_v39  ;;  %v493_v39 = vld [vmem:[#allocation5 + $0x310] sm:$0xff] }
  0x6e   : > { %429 = vmatpush.msrb.mxu0 %v400_v40  ;;  %v570_v40 = vld [vmem:[#allocation5 + $0x410] sm:$0xff] }
  0x70   : > { %430 = vmatpush.msrb.mxu0 %v399_v41  ;;  %v492_v41 = vld [vmem:[#allocation5 + $0x308] sm:$0xff] }
  0xcd   : > { %v255_v47 = vpop.f32.mrf.mxu0 }
  0xce   : > { %v256_v48 = vadd.f32 %v815_v46, %v255_v47  ;;  %v463_v46 = vld [vmem:[#allocation5 + $0x2d8] sm:$0xff]  ;;  %v462_v47 = vld [vmem:[#allocation5 + $0x2d0] sm:$0xff] }
  0xcf   : > { %474 = vmatpush.msrb.mxu1 %v463_v46 }
  0xd0   : > { %v258_v49 = vmax.f32 %v256_v48, 0.0  ;;  %v461_v48 = vld [vmem:[#allocation5 + $0x2c8] sm:$0xff] }
  0xd1   : > { %475 = vmatpush.msrb.mxu1 %v462_v47  ;;  %v819_v47 = vld [vmem:[#allocation7 + $0x3] ss:$0 sm:$0xff] }
  0xd2   : > { %293 = vmatmul.f32.vlgmr.msra.gmra.mxu1 %v258_v49 }
  0xd3   : > { %476 = vmatpush.msrb.mxu1 %v461_v48 }
  0xd5   : > { %477 = vmatpush.msrb.mxu1 %v460_v50 }
  0xd7   : > { %478 = vmatpush.msrb.mxu1 %v459_v51 }
  0xd9   : > { %479 = vmatpush.msrb.mxu1 %v458_v55  ;;  %v545_v55 = vld [vmem:[#allocation5 + $0x3f8] sm:$0xff] }
  0xda   : > { %548 = vmatpush.msrb.mxu3 %v545_v55 }
  0xdb   : > { %480 = vmatpush.msrb.mxu1 %v457_v57  ;;  %v544_v57 = vld [vmem:[#allocation5 + $0x3f0] sm:$0xff] }
  0xdc   : > { %549 = vmatpush.msrb.mxu3 %v544_v57 }
  0xdd   : > { %481 = vmatpush.msrb.mxu1 %v456_v58  ;;  %v543_v58 = vld [vmem:[#allocation5 + $0x3e8] sm:$0xff] }
  0xde   : > { %550 = vmatpush.msrb.mxu3 %v543_v58 }
  0xdf   : > { %482 = vmatpush.msrb.mxu1 %v455_v63  ;;  %v538_v63 = vld [vmem:[#allocation5 + $0x3c0] sm:$0xff] }
  0xe1   : > { %483 = vmatpush.msrb.mxu1 %v454_v1  ;;  %v536_v1 = vld [vmem:[#allocation5 + $0x3b0] sm:$0xff] }
  0xe3   : > { %484 = vmatpush.msrb.mxu1 %v453_v3 }
  0xe5   : > { %485 = vmatpush.msrb.mxu1 %v452_v7  ;;  %v534_v7 = vld [vmem:[#allocation5 + $0x3a0] sm:$0xff] }
 0x14f   : > { %v294_v4 = vpop.f32.mrf.mxu1 }
 0x150   : > { %v295_v5 = vadd.f32 %v816_v2, %v294_v4 }
 0x152   : > { %v297_v6 = vmax.f32 %v295_v5, 0.0 }
 0x154   : > { %332 = vmatmul.f32.vlgmr.msra.gmra.mxu2 %v297_v6 }
 0x1d7   : > { %v333_v10 = vpop.f32.mrf.mxu2 }
 0x1d8   : > { %v1126_v11 = vadd.f32 %v817_v9, %v333_v10  ;;  %v583_v9 = vld [vmem:[#allocation5 + $0x478] sm:$0xff]  ;;  %v505_v10 = vld [vmem:[#allocation5 + $0x370] sm:$0xff] }
 0x1d9   : > { %586 = vmatpush.msra.mxu0 %v583_v9  ;;  %510 = vmatpush.msrb.mxu2 %v505_v10  ;;  %v532_v9 = vld [vmem:[#allocation5 + $0x390] sm:$0xff]  ;;  %v531_v10 = vld [vmem:[#allocation5 + $0x388] sm:$0xff] }
 0x1da   : > { %369 = vmatmul.f32.vlgmr.msra.gmra.mxu3 %v1126_v11 }
 0x25d   : > { %v370_v13 = vpop.f32.mrf.mxu3 }
 0x25e   : > { %v373_v14 = vmul.f32 2.0, %v370_v13  ;;  %v504_v13 = vld [vmem:[#allocation5 + $0x368] sm:$0xff] }
 0x25f   : > { %511 = vmatpush.msrb.mxu2 %v504_v13 }
 0x260   : > { %v375_v15 = vsub.f32 %v818_v12, %v373_v14  ;;  %v582_v12 = vld [vmem:[#allocation5 + $0x470] sm:$0xff]  ;;  %v581_v14 = vld [vmem:[#allocation5 + $0x468] sm:$0xff] }
 0x261   : > { %587 = vmatpush.msra.mxu0 %v582_v12  ;;  %v530_v12 = vld [vmem:[#allocation5 + $0x380] sm:$0xff] }
 0x262   : > { %376 = vmin.xlane.f32.xlu0 %v375_v15 }
 0x263   : > { %588 = vmatpush.msra.mxu0 %v581_v14  ;;  %v821_v14 = vld [vmem:[#allocation7 + $0x4] ss:$0 sm:$0xff] }
 0x265   : > { %589 = vmatpush.msra.mxu0 %v580_v16 }
 0x2d5   : > { %v377_v18 = vpop.xlane.xlu0 %376 }
 0x2d6   : > { %vm380_vm0 = vcmp.eq.f32.partialorder %v375_v15, %v377_v18  ;;  %v503_v15 = vld [vmem:[#allocation5 + $0x360] sm:$0xff]  ;;  %v502_v18 = vld [vmem:[#allocation5 + $0x358] sm:$0xff] }
 0x2d7   : > { %v381_v19 = vsel %vm380_vm0, %v1129_v17, 128  ;;  %512 = vmatpush.msrb.mxu2 %v503_v15 }
 0x2d8   : > { %v383_v20 = vshra.s32 %v381_v19, 16  ;;  %v382_v35 = vand.u32 65535, %v381_v19  ;;  %v579_v19 = vld [vmem:[#allocation5 + $0x458] sm:$0xff] }
 0x2d9   : > { %513 = vmatpush.msrb.mxu2 %v502_v18  ;;  %590 = vmatpush.msra.mxu0 %v579_v19  ;;  %v822_v19 = vld [vmem:[#allocation7 + $0x5] ss:$0 sm:$0xff] }
 0x2da   : > { %v385_v21 = vcvt.s32.f32 %v383_v20  ;;  %v384_v37 = vcvt.s32.f32 %v382_v35  ;;  %v501_v20 = vld [vmem:[#allocation5 + $0x350] sm:$0xff]  ;;  %v495_v35 = vld [vmem:[#allocation5 + $0x320] sm:$0xff] }
 0x2db   : > { %514 = vmatpush.msrb.mxu2 %v501_v20 }
 0x2dc   : > { %386 = vmin.xlane.f32.xlu0 %v385_v21 }
 0x2dd   : > { %515 = vmatpush.msrb.mxu2 %v500_v22 }
 0x2df   : > { %516 = vmatpush.msrb.mxu2 %v499_v24 }
 0x2e1   : > { %517 = vmatpush.msrb.mxu2 %v498_v26 }
 0x2e3   : > { %518 = vmatpush.msrb.mxu2 %v497_v28 }
 0x2e5   : > { %519 = vmatpush.msrb.mxu2 %v496_v30 }
 0x2e7   : > { %520 = vmatpush.msrb.mxu2 %v495_v35 }
 0x34f   : > { %v387_v36 = vpop.xlane.xlu0 %386 }
 0x350   : > { %vm388_vm1 = vcmp.eq.f32.partialorder %v385_v21, %v387_v36  ;;  %v393_v49 = vcvt.f32.s32 %v387_v36  ;;  %v578_v21 = vld [vmem:[#allocation5 + $0x450] sm:$0xff]  ;;  %v572_v36 = vld [vmem:[#allocation5 + $0x420] sm:$0xff] }
 0x351   : > { %v389_v38 = vsel %vm388_vm1, %v384_v37, inf  ;;  %591 = vmatpush.msra.mxu0 %v578_v21  ;;  %v494_v37 = vld [vmem:[#allocation5 + $0x318] sm:$0xff] }
 0x352   : > { %390 = vmin.xlane.f32.xlu1 %v389_v38  ;;  %v394_v53 = vshll.u32 %v393_v49, 16  ;;  %v571_v38 = vld [vmem:[#allocation5 + $0x418] sm:$0xff]  ;;  %521 = vmatpush.msrb.mxu2 %v494_v37 }
 0x353   : > { %592 = vmatpush.msra.mxu0 %v577_v23 }
 0x354   : > { %522 = vmatpush.msrb.mxu2 %v493_v39 }
 0x355   : > { %593 = vmatpush.msra.mxu0 %v576_v25 }
 0x356   : > { %523 = vmatpush.msrb.mxu2 %v492_v41 }
 0x357   : > { %594 = vmatpush.msra.mxu0 %v575_v27 }
 0x359   : > { %595 = vmatpush.msra.mxu0 %v574_v29 }
 0x35b   : > { %596 = vmatpush.msra.mxu0 %v573_v31 }
 0x35d   : > { %597 = vmatpush.msra.mxu0 %v572_v36 }
 0x35f   : > { %598 = vmatpush.msra.mxu0 %v571_v38 }
 0x361   : > { %599 = vmatpush.msra.mxu0 %v570_v40 }
 0x363   : > { %600 = vmatpush.msra.mxu0 %v569_v42 }
 0x365   : > { %601 = vmatpush.msra.mxu0 %v568_v43 }
 0x3c5   : > { %v391_v52 = vpop.xlane.xlu1 %390 }
 0x3c6   : > { %v392_v54 = vcvt.f32.s32 %v391_v52 }
 0x3c8   : > { %v1132_v56 = vadd.s32 %v394_v53, %v392_v54 }
 0x3ca   : > { %vm396_vm2 = vcmp.eq.s32.totalorder %v1129_v17, %v1132_v56  ;;  %v607_v3 = vcvt.s32.f32 %v1132_v56  ;;  %v820_v17 = vld [vmem:[#allocation7 + $0x6] ss:$0 sm:$0xff] }
 0x3cb   : > { %v734_v60 = vsel %vm396_vm2, 1.0, %v989_v59  ;;  %735 = vmatmul.msk.f32.vlgmr.msrb.gmra.mxu0 %vm396_vm2, %v990_v61  ;;  %v542_v59 = vld [vmem:[#allocation5 + $0x3e0] sm:$0xff]  ;;  %v540_v61 = vld [vmem:[#allocation5 + $0x3d0] sm:$0xff] }
 0x3cc   : > { %v446_v62 = vrot.slane %v734_v60, 4  ;;  %551 = vmatpush.msrb.mxu3 %v542_v59 }
 0x3ce   : > { %v447_v0 = vadd.f32 %v734_v60, %v446_v62  ;;  %v541_v60 = vld [vmem:[#allocation5 + $0x3d8] sm:$0xff]  ;;  %v539_v62 = vld [vmem:[#allocation5 + $0x3c8] sm:$0xff] }
 0x3cf   : > { %552 = vmatpush.msrb.mxu3 %v541_v60 }
 0x3d0   : > { %v448_v2 = vrot.slane %v447_v0, 2 }
 0x3d1   : > { %553 = vmatpush.msrb.mxu3 %v540_v61 }
 0x3d2   : > { %v449_v4 = vadd.f32 %v448_v2, %v447_v0  ;;  %v537_v0 = vld [vmem:[#allocation5 + $0x3b8] sm:$0xff]  ;;  %v535_v2 = vld [vmem:[#allocation5 + $0x3a8] sm:$0xff] }
 0x3d3   : > { %554 = vmatpush.msrb.mxu3 %v539_v62 }
 0x3d4   : > { %v450_v5 = vrot.slane %v449_v4, 1 }
 0x3d5   : > { %555 = vmatpush.msrb.mxu3 %v538_v63 }
 0x3d6   : > { %v451_v6 = vadd.f32 %v450_v5, %v449_v4 }
 0x3d7   : > { %556 = vmatpush.msrb.mxu3 %v537_v0 }
 0x3d8   : > { %615 = vst [vmem:[%s1137_s9 + $0x18] sm:$0xff] %v451_v6 }
 0x3d9   : > { %557 = vmatpush.msrb.mxu3 %v536_v1 }
 0x3db   : > { %558 = vmatpush.msrb.mxu3 %v535_v2 }
 0x3dd   : > { %559 = vmatpush.msrb.mxu3 %v534_v7 }
 0x3df   : > { %560 = vmatpush.msrb.mxu3 %v533_v8 }
 0x3e1   : > { %561 = vmatpush.msrb.mxu3 %v532_v9 }
 0x3e3   : > { %562 = vmatpush.msrb.mxu3 %v531_v10 }
 0x3e5   : > { %563 = vmatpush.msrb.mxu3 %v530_v12 }
 0x448   : > { %v432_v32 = vpop.f32.mrf.mxu0 }
 0x449   : > { %v435_v33 = vsub.f32 %v432_v32, %v1126_v11  ;;  %486 = vmatmul.f32.vlgmr.msrb.gmra.mxu1 %v432_v32  ;;  %v491_v11 = vld [vmem:[#allocation5 + $0x300] sm:$0xff] }
 0x44a   : > { %524 = vmatpush.msrb.mxu2 %v491_v11 }
 0x44b   : > { %v436_v34 = vmul.f32 %v435_v33, %v435_v33 }
 0x44d   : > { %437 = vadd.xlane.f32.xlu1 %v436_v34 }
 0x4c0   : > { %v438_v44 = vpop.xlane.xlu1 %437 }
 0x4c1   : > { %v439_v45 = vrot.slane %v438_v44, 4 }
 0x4c3   : > { %v440_v46 = vadd.f32 %v439_v45, %v438_v44 }
 0x4c5   : > { %v441_v48 = vrot.slane %v440_v46, 2 }
 0x4c6   : > { %v487_v49 = vpop.f32.mrf.mxu1 }
 0x4c7   : > { %v488_v50 = vadd.f32 %v819_v47, %v487_v49  ;;  %v442_v51 = vadd.f32 %v441_v48, %v440_v46 }
 0x4c9   : > { %v490_v52 = vmax.f32 %v488_v50, 0.0  ;;  %v443_v53 = vrot.slane %v442_v51, 1 }
 0x4cb   : > { %525 = vmatmul.f32.vlgmr.msrb.gmra.mxu2 %v490_v52  ;;  %602 = vmatmul.f32.vlgmr.msra.gmra.mxu0 %v490_v52  ;;  %v444_v54 = vadd.f32 %v443_v53, %v442_v51 }
 0x4cd   : > { %742 = vpush %v444_v54 }
 0x4fe   : > { %s743_s24 = spop %742 }
 0x4ff   : > { %v609_v4 = vstv %s743_s24 }
 0x500   : > { %v610_v5 = vsel %vm608_vm3, %v609_v4, 0.0 }
 0x501   : > { %v611_v6 = vsel %vm606_vm4, %v607_v3, %v610_v5 }
 0x502   : > { %614 = vst [vmem:[%s1137_s9 + $0x10] sm:$0xff] %v611_v6 }
 0x548   : > { %v603_v13 = vpop.f32.mrf.mxu0 }
 0x549   : > { %v604_v56 = vadd.f32 %v820_v17, %v603_v13 }
 0x54b   : > { %613 = vst [vmem:[%s1137_s9 + $0x8] sm:$0xff] %v604_v56 }
 0x54e   : > { %v526_v15 = vpop.f32.mrf.mxu2 }
 0x54f   : > { %v527_v16 = vadd.f32 %v821_v14, %v526_v15 }
 0x551   : > { %v529_v18 = vmax.f32 %v527_v16, 0.0 }
 0x553   : > { %564 = vmatmul.f32.vlgmr.msrb.gmra.mxu3 %v529_v18 }
 0x5d6   : > { %v565_v20 = vpop.f32.mrf.mxu3 }
 0x5d7   : > { %v566_v21 = vadd.f32 %v822_v19, %v565_v20 }
 0x5d9   : > { %612 = vst [vmem:[%s1137_s9] sm:$0xff] %v566_v21 }
 0x5da   : > { %940 = shalt.err (!%p937_p9)
}
 0x5db   : > { %754 = dma.vmem_to_hbm [thread:$0]  (%p1080_p4), %s631_s29, 512, %s633_s30, %s617_s5  }
 0x5dc PF: > { %s644_s10 = sand.u32 1, %s971_s12   ;;  %p1191_p10 = scmp.ge.s32.totalorder %s983_s15, 2 }
 0x5dd   : > { %s645_s23 = scalar_lea.sflag [#allocation4], %s644_s10 }
 0x5de   : > { %p768_p13 = pnand %p1191_p10, %p1084_p6 }
 0x5e0   : > { %p769_p11 = pneg %p768_p13 }
 0x5e2   : > { %966 = dma.done.wait (%p769_p11), %s645_s23, 512  }
 0x5e3   : > { %968 = vsyncadd (%p769_p11), %s645_s23, 4294966784  ;;  %p17_p0 = scmp.ge.s32.totalorder %s1054_s4, 4   ;;  %s1192_s12 = smov %s975_s13 }
 0x5e4   : > { %s1193_s13 = smov %s979_s14  ;;  %s1194_s14 = smov %s1065_s7 }
 0x5e5   : > { %s1195_s15 = smov %s1054_s4  ;;  %19 = sbr.rel (!%p17_p0) target bundleno = 6 (0x6), region = 85 }
 0x5ea   :  { %651 = vsyncpa [#allocation3], 1 }
 0x5eb   :  { %653 = vsyncpa [#allocation3 + $0x1], 1 }
 0x5ec   :  { %654 = vsyncpa [#allocation6], 1 }
 0x5ed   :  { %655 = vsyncpa [#allocation4], 1 }
 0x5ee   :  { %657 = vsyncpa [#allocation4 + $0x1], 1 }

</bundles_post_ra>
